<compile_context>
chip_gen: v7x
topology: tpu7x:2x2x1
jax: 0.10.0
libtpu: 0.0.40
codegen_flags: <defaults>
</compile_context>

<pallas_src>
import functools

import jax
import jax.numpy as jnp
import numpy as np
from jax.experimental import pallas as pl
from jax.experimental.pallas import tpu as pltpu

D_MODEL = 32
N_HEAD = 4
HEAD_DIM = D_MODEL // N_HEAD
SEQ_LEN = 8
BATCH = 2
LN_EPS = 1e-5
NEG_BIG = -1e30


def _layernorm(v, w, b):
    mu = jnp.mean(v, axis=-1, keepdims=True)
    var = jnp.mean((v - mu) ** 2, axis=-1, keepdims=True)
    return (v - mu) * jax.lax.rsqrt(var + LN_EPS) * w + b


def _block_kernel(x_ref, vec_ref, wqkv_ref, bqkv_ref, wout_ref,
                  wfc_ref, bfc_ref, wproj_ref, o_ref, *, n_head, batch):
    T, D = x_ref.shape                       # T = seq_len * batch, rows ordered (l, n)
    head_dim = D // n_head

    x = x_ref[...].astype(jnp.float32)       # (T, D)

    ln1_w, ln1_b = vec_ref[0], vec_ref[1]
    b_out = vec_ref[2]
    ln2_w, ln2_b = vec_ref[3], vec_ref[4]
    b_proj = vec_ref[5]

    # Block-diagonal (same-batch-element) attention bias, built once on the VPU.
    row_b = jax.lax.broadcasted_iota(jnp.int32, (T, T), 0) % batch
    col_b = jax.lax.broadcasted_iota(jnp.int32, (T, T), 1) % batch
    bias = jnp.where(row_b == col_b, jnp.float32(0.0), jnp.float32(NEG_BIG))

    # ---- ln_1 + multi-head self-attention ----
    h = _layernorm(x, ln1_w, ln1_b)
    # w_qkv is pre-transposed to (D, 3D); the 1/sqrt(head_dim) scale is folded into its q part.
    qkv = jnp.dot(h, wqkv_ref[...], preferred_element_type=jnp.float32) + bqkv_ref[0]  # (T, 3D)
    q = qkv[:, 0 * D:1 * D]
    k = qkv[:, 1 * D:2 * D]
    v = qkv[:, 2 * D:3 * D]

    wout = wout_ref[...]                     # (D, D), (in, out) layout
    attn = jnp.zeros((T, D), dtype=jnp.float32)
    for hd in range(n_head):                 # static unroll over heads
        sl = slice(hd * head_dim, (hd + 1) * head_dim)
        qh, kh, vh = q[:, sl], k[:, sl], v[:, sl]                          # (T, head_dim)
        s = jnp.dot(qh, kh.T, preferred_element_type=jnp.float32) + bias   # (T, T)
        s = s - jnp.max(s, axis=-1, keepdims=True)
        p = jnp.exp(s)
        p = p * pl.reciprocal(jnp.sum(p, axis=-1, keepdims=True), approx=True)
        oh = jnp.dot(p, vh, preferred_element_type=jnp.float32)            # (T, head_dim)
        # Project this head through its rows of the output projection (replaces concat).
        attn = attn + jnp.dot(oh, wout[sl, :], preferred_element_type=jnp.float32)
    attn = attn + b_out

    x1 = x + attn                            # first residual

    # ---- ln_2 + MLP (c_fc -> QuickGELU -> c_proj) ----
    h2 = _layernorm(x1, ln2_w, ln2_b)
    f = jnp.dot(h2, wfc_ref[...], preferred_element_type=jnp.float32) + bfc_ref[0]   # (T, 4D)
    f = f * jax.nn.sigmoid(1.702 * f)        # QuickGELU
    m = jnp.dot(f, wproj_ref[...], preferred_element_type=jnp.float32) + b_proj      # (T, D)

    # TODO(synk): last dim is 32 lanes -> masked stores; at production sizes keep d_model a
    # multiple of 128 for lane-dense stores.
    o_ref[...] = (x1 + m).astype(o_ref.dtype)


def residual_attention_block(x, kparams):
    """x: (L, N, D) float32 (seq, batch, d_model), like PyTorch MHA with batch_first=False."""
    L, N, D = x.shape
    xf = x.reshape(L * N, D)                 # free: row-major order unchanged (no transpose)

    kernel = functools.partial(_block_kernel, n_head=N_HEAD, batch=N)
    vmem = pl.BlockSpec(memory_space=pltpu.MemorySpace.VMEM)
    out = pl.pallas_call(
        kernel,
        out_shape=jax.ShapeDtypeStruct((L * N, D), x.dtype),
        in_specs=[vmem] * 8,
        out_specs=vmem,
    )(xf, kparams["vecs"], kparams["w_qkv"], kparams["b_qkv"],
      kparams["w_out"], kparams["w_fc"], kparams["b_fc"], kparams["w_proj"])
    return out.reshape(L, N, D)


def prepare_params(params, n_head=N_HEAD):
    """One-time host-side param transform: transpose weights to (in, out), fold softmax scale
    into the q projection, and pack the six D-sized vectors into one (6, D) operand."""
    D = params["w_out"].shape[0]
    head_dim = D // n_head
    scale = 1.0 / float(np.sqrt(head_dim))
    col_scale = jnp.concatenate([jnp.full((D,), scale, jnp.float32),
                                 jnp.ones((2 * D,), jnp.float32)])
    w_qkv_t = params["w_qkv"].T * col_scale[None, :]                 # (D, 3D)
    b_qkv = (params["b_qkv"][0] * col_scale).reshape(1, 3 * D)

    vecs = jnp.stack([params["ln1_w"][0], params["ln1_b"][0],
                      params["b_out"][0],
                      params["ln2_w"][0], params["ln2_b"][0],
                      params["b_proj"][0]], axis=0)                  # (6, D)

    return {
        "vecs": vecs.astype(jnp.float32),
        "w_qkv": w_qkv_t.astype(jnp.float32),                        # (D, 3D)
        "b_qkv": b_qkv.astype(jnp.float32),                          # (1, 3D)
        "w_out": params["w_out"].T.astype(jnp.float32),              # (D, D)
        "w_fc": params["w_fc"].T.astype(jnp.float32),                # (D, 4D)
        "b_fc": params["b_fc"].astype(jnp.float32),                  # (1, 4D)
        "w_proj": params["w_proj"].T.astype(jnp.float32),            # (4D, D)
    }


def init_params(key, d_model=D_MODEL):
    ks = jax.random.split(key, 8)
    s = 0.02
    p = {
        "ln1_w": (1.0 + s * jax.random.normal(ks[0], (d_model,))).reshape(1, d_model),
        "ln1_b": (s * jax.random.normal(ks[1], (d_model,))).reshape(1, d_model),
        "w_qkv": s * jax.random.normal(ks[2], (3 * d_model, d_model)),
        "b_qkv": (s * jax.random.normal(ks[3], (3 * d_model,))).reshape(1, 3 * d_model),
        "w_out": s * jax.random.normal(ks[4], (d_model, d_model)),
        "b_out": (s * jax.random.normal(ks[5], (d_model,))).reshape(1, d_model),
        "ln2_w": (1.0 + s * jax.random.normal(ks[6], (d_model,))).reshape(1, d_model),
        "ln2_b": (s * jax.random.normal(ks[7], (d_model,))).reshape(1, d_model),
        "w_fc": s * jax.random.normal(jax.random.fold_in(key, 10), (4 * d_model, d_model)),
        "b_fc": (s * jax.random.normal(jax.random.fold_in(key, 11), (4 * d_model,))).reshape(1, 4 * d_model),
        "w_proj": s * jax.random.normal(jax.random.fold_in(key, 12), (d_model, 4 * d_model)),
        "b_proj": (s * jax.random.normal(jax.random.fold_in(key, 13), (d_model,))).reshape(1, d_model),
    }
    return {k: v.astype(jnp.float32) for k, v in p.items()}


def reference_block(x, params):
    """Pure-JAX reference mirroring the PyTorch forward (TA=False path)."""
    L, N, D = x.shape

    def ln(v, w, b):
        mu = jnp.mean(v, axis=-1, keepdims=True)
        var = jnp.mean((v - mu) ** 2, axis=-1, keepdims=True)
        return (v - mu) / jnp.sqrt(var + LN_EPS) * w[0] + b[0]

    h = ln(x, params["ln1_w"], params["ln1_b"])
    qkv = jnp.einsum("lnd,ed->lne", h, params["w_qkv"]) + params["b_qkv"][0]
    q, k, v = jnp.split(qkv, 3, axis=-1)

    def heads(t):  # (L, N, D) -> (N, H, L, hd)
        return jnp.transpose(t.reshape(L, N, N_HEAD, HEAD_DIM), (1, 2, 0, 3))

    qh, kh, vh = heads(q), heads(k), heads(v)
    s = jnp.einsum("nhld,nhkd->nhlk", qh, kh) / np.sqrt(HEAD_DIM)
    p = jax.nn.softmax(s, axis=-1)
    o = jnp.einsum("nhlk,nhkd->nhld", p, vh)
    o = jnp.transpose(o, (2, 0, 1, 3)).reshape(L, N, D)
    attn = jnp.einsum("lnd,ed->lne", o, params["w_out"]) + params["b_out"][0]
    x1 = x + attn

    h2 = ln(x1, params["ln2_w"], params["ln2_b"])
    f = jnp.einsum("lnd,ed->lne", h2, params["w_fc"]) + params["b_fc"][0]
    f = f * jax.nn.sigmoid(1.702 * f)
    m = jnp.einsum("lne,de->lnd", f, params["w_proj"]) + params["b_proj"][0]
    return x1 + m


if __name__ == "__main__":
    key = jax.random.PRNGKey(0)
    kx, kp = jax.random.split(key)
    x = jax.random.normal(kx, (SEQ_LEN, BATCH, D_MODEL), dtype=jnp.float32)
    params = init_params(kp)
    kparams = prepare_params(params)          # one-time host-side transform

    out = jax.block_until_ready(residual_attention_block(x, kparams))
    ref = jax.block_until_ready(reference_block(x, params))
    np.testing.assert_allclose(np.asarray(out), np.asarray(ref), rtol=1e-3, atol=1e-3)

    print("KERNEL_OK")
</pallas_src>

<mosaic_0001>
module attributes {stable_mosaic.version = 11 : i64} {
  func.func @_block_kernel(%arg0: memref<16x32xf32, #tpu.memory_space<vmem>>, %arg1: memref<6x32xf32, #tpu.memory_space<vmem>>, %arg2: memref<32x96xf32, #tpu.memory_space<vmem>>, %arg3: memref<1x96xf32, #tpu.memory_space<vmem>>, %arg4: memref<32x32xf32, #tpu.memory_space<vmem>>, %arg5: memref<32x128xf32, #tpu.memory_space<vmem>>, %arg6: memref<1x128xf32, #tpu.memory_space<vmem>>, %arg7: memref<128x32xf32, #tpu.memory_space<vmem>>, %arg8: memref<16x32xf32, #tpu.memory_space<vmem>>) attributes {dimension_semantics = [], scalar_prefetch = 0 : i64, scratch_operands = 0 : i64, tpu.core_type = #tpu.core_type<tc>} {
    %c0 = arith.constant 0 : index
    %c0_0 = arith.constant 0 : index
    %0 = vector.load %arg0[%c0, %c0_0] : memref<16x32xf32, #tpu.memory_space<vmem>>, vector<16x32xf32>
    %c0_1 = arith.constant 0 : index
    %c0_2 = arith.constant 0 : index
    %1 = vector.load %arg1[%c0_1, %c0_2] : memref<6x32xf32, #tpu.memory_space<vmem>>, vector<1x32xf32>
    %2 = vector.shape_cast %1 : vector<1x32xf32> to vector<32xf32>
    %c1 = arith.constant 1 : index
    %c0_3 = arith.constant 0 : index
    %3 = vector.load %arg1[%c1, %c0_3] : memref<6x32xf32, #tpu.memory_space<vmem>>, vector<1x32xf32>
    %4 = vector.shape_cast %3 : vector<1x32xf32> to vector<32xf32>
    %c2 = arith.constant 2 : index
    %c0_4 = arith.constant 0 : index
    %5 = vector.load %arg1[%c2, %c0_4] : memref<6x32xf32, #tpu.memory_space<vmem>>, vector<1x32xf32>
    %6 = vector.shape_cast %5 : vector<1x32xf32> to vector<32xf32>
    %c3 = arith.constant 3 : index
    %c0_5 = arith.constant 0 : index
    %7 = vector.load %arg1[%c3, %c0_5] : memref<6x32xf32, #tpu.memory_space<vmem>>, vector<1x32xf32>
    %8 = vector.shape_cast %7 : vector<1x32xf32> to vector<32xf32>
    %c4 = arith.constant 4 : index
    %c0_6 = arith.constant 0 : index
    %9 = vector.load %arg1[%c4, %c0_6] : memref<6x32xf32, #tpu.memory_space<vmem>>, vector<1x32xf32>
    %10 = vector.shape_cast %9 : vector<1x32xf32> to vector<32xf32>
    %c5 = arith.constant 5 : index
    %c0_7 = arith.constant 0 : index
    %11 = vector.load %arg1[%c5, %c0_7] : memref<6x32xf32, #tpu.memory_space<vmem>>, vector<1x32xf32>
    %12 = vector.shape_cast %11 : vector<1x32xf32> to vector<32xf32>
    %13 = tpu.iota {dimensions = array<i32: 0>} : vector<16x16xi32>
    %c2_i32 = arith.constant 2 : i32
    %c0_i32 = arith.constant 0 : i32
    %14 = arith.cmpi eq, %c2_i32, %c0_i32 : i32
    %c1_i32 = arith.constant 1 : i32
    %15 = arith.select %14, %c1_i32, %c2_i32 : i32
    %16 = vector.broadcast %15 : i32 to vector<16x16xi32>
    %17 = arith.remsi %13, %16 : vector<16x16xi32>
    %c0_i32_8 = arith.constant 0 : i32
    %18 = vector.broadcast %c0_i32_8 : i32 to vector<16x16xi32>
    %19 = arith.cmpi ne, %17, %18 : vector<16x16xi32>
    %c0_i32_9 = arith.constant 0 : i32
    %20 = vector.broadcast %c0_i32_9 : i32 to vector<16x16xi32>
    %21 = arith.cmpi slt, %17, %20 : vector<16x16xi32>
    %c0_i32_10 = arith.constant 0 : i32
    %22 = arith.cmpi slt, %15, %c0_i32_10 : i32
    %23 = vector.broadcast %22 : i1 to vector<16x16xi1>
    %24 = vector.broadcast %23 : vector<16x16xi1> to vector<16x16xi1>
    %25 = arith.xori %21, %24 : vector<16x16xi1>
    %26 = arith.andi %25, %19 : vector<16x16xi1>
    %27 = vector.broadcast %15 : i32 to vector<16x16xi32>
    %28 = arith.addi %17, %27 : vector<16x16xi32>
    %29 = arith.select %26, %28, %17 : vector<16x16xi1>, vector<16x16xi32>
    %30 = tpu.iota {dimensions = array<i32: 1>} : vector<16x16xi32>
    %c2_i32_11 = arith.constant 2 : i32
    %c0_i32_12 = arith.constant 0 : i32
    %31 = arith.cmpi eq, %c2_i32_11, %c0_i32_12 : i32
    %c1_i32_13 = arith.constant 1 : i32
    %32 = arith.select %31, %c1_i32_13, %c2_i32_11 : i32
    %33 = vector.broadcast %32 : i32 to vector<16x16xi32>
    %34 = arith.remsi %30, %33 : vector<16x16xi32>
    %c0_i32_14 = arith.constant 0 : i32
    %35 = vector.broadcast %c0_i32_14 : i32 to vector<16x16xi32>
    %36 = arith.cmpi ne, %34, %35 : vector<16x16xi32>
    %c0_i32_15 = arith.constant 0 : i32
    %37 = vector.broadcast %c0_i32_15 : i32 to vector<16x16xi32>
    %38 = arith.cmpi slt, %34, %37 : vector<16x16xi32>
    %c0_i32_16 = arith.constant 0 : i32
    %39 = arith.cmpi slt, %32, %c0_i32_16 : i32
    %40 = vector.broadcast %39 : i1 to vector<16x16xi1>
    %41 = vector.broadcast %40 : vector<16x16xi1> to vector<16x16xi1>
    %42 = arith.xori %38, %41 : vector<16x16xi1>
    %43 = arith.andi %42, %36 : vector<16x16xi1>
    %44 = vector.broadcast %32 : i32 to vector<16x16xi32>
    %45 = arith.addi %34, %44 : vector<16x16xi32>
    %46 = arith.select %43, %45, %34 : vector<16x16xi1>, vector<16x16xi32>
    %47 = arith.cmpi eq, %29, %46 : vector<16x16xi32>
    %cst = arith.constant 0.000000e+00 : f32
    %cst_17 = arith.constant -1.000000e+30 : f32
    %48 = vector.broadcast %cst : f32 to vector<16x16xf32>
    %49 = vector.broadcast %cst_17 : f32 to vector<16x16xf32>
    %50 = arith.select %47, %48, %49 : vector<16x16xi1>, vector<16x16xf32>
    %cst_18 = arith.constant dense<0.000000e+00> : vector<16xf32>
    %51 = vector.multi_reduction <add>, %0, %cst_18 [1] : vector<16x32xf32> to vector<16xf32>
    %52 = vector.shape_cast %51 : vector<16xf32> to vector<16x1xf32>
    %cst_19 = arith.constant 3.200000e+01 : f32
    %53 = vector.broadcast %cst_19 : f32 to vector<16x1xf32>
    %54 = arith.divf %52, %53 : vector<16x1xf32>
    %55 = vector.broadcast %54 : vector<16x1xf32> to vector<16x32xf32>
    %56 = arith.subf %0, %55 : vector<16x32xf32>
    %57 = arith.mulf %56, %56 : vector<16x32xf32>
    %cst_20 = arith.constant dense<0.000000e+00> : vector<16xf32>
    %58 = vector.multi_reduction <add>, %57, %cst_20 [1] : vector<16x32xf32> to vector<16xf32>
    %59 = vector.shape_cast %58 : vector<16xf32> to vector<16x1xf32>
    %cst_21 = arith.constant 3.200000e+01 : f32
    %60 = vector.broadcast %cst_21 : f32 to vector<16x1xf32>
    %61 = arith.divf %59, %60 : vector<16x1xf32>
    %62 = vector.broadcast %54 : vector<16x1xf32> to vector<16x32xf32>
    %63 = arith.subf %0, %62 : vector<16x32xf32>
    %cst_22 = arith.constant 9.99999974E-6 : f32
    %64 = vector.broadcast %cst_22 : f32 to vector<16x1xf32>
    %65 = arith.addf %61, %64 : vector<16x1xf32>
    %66 = math.rsqrt %65 : vector<16x1xf32>
    %67 = vector.broadcast %66 : vector<16x1xf32> to vector<16x32xf32>
    %68 = arith.mulf %63, %67 : vector<16x32xf32>
    %69 = vector.shape_cast %2 : vector<32xf32> to vector<1x32xf32>
    %70 = vector.broadcast %69 : vector<1x32xf32> to vector<16x32xf32>
    %71 = arith.mulf %68, %70 : vector<16x32xf32>
    %72 = vector.shape_cast %4 : vector<32xf32> to vector<1x32xf32>
    %73 = vector.broadcast %72 : vector<1x32xf32> to vector<16x32xf32>
    %74 = arith.addf %71, %73 : vector<16x32xf32>
    %c0_23 = arith.constant 0 : index
    %c0_24 = arith.constant 0 : index
    %75 = vector.load %arg2[%c0_23, %c0_24] : memref<32x96xf32, #tpu.memory_space<vmem>>, vector<32x96xf32>
    %cst_25 = arith.constant dense<0.000000e+00> : vector<16x96xf32>
    %76 = tpu.matmul %74, %75, %cst_25 {dimension_numbers = #tpu.dot_dimension_numbers<[1], [0], [0], [1], [0, 0, 1, 1], [], []>} : vector<16x32xf32>, vector<32x96xf32>, vector<16x96xf32> -> vector<16x96xf32>
    %c0_26 = arith.constant 0 : index
    %c0_27 = arith.constant 0 : index
    %77 = vector.load %arg3[%c0_26, %c0_27] : memref<1x96xf32, #tpu.memory_space<vmem>>, vector<1x96xf32>
    %78 = vector.shape_cast %77 : vector<1x96xf32> to vector<96xf32>
    %79 = vector.shape_cast %78 : vector<96xf32> to vector<1x96xf32>
    %80 = vector.broadcast %79 : vector<1x96xf32> to vector<16x96xf32>
    %81 = arith.addf %76, %80 : vector<16x96xf32>
    %82 = vector.extract_strided_slice %81 {offsets = [0, 0], sizes = [16, 32], strides = [1, 1]} : vector<16x96xf32> to vector<16x32xf32>
    %83 = vector.extract_strided_slice %81 {offsets = [0, 32], sizes = [16, 32], strides = [1, 1]} : vector<16x96xf32> to vector<16x32xf32>
    %84 = vector.extract_strided_slice %81 {offsets = [0, 64], sizes = [16, 32], strides = [1, 1]} : vector<16x96xf32> to vector<16x32xf32>
    %c0_28 = arith.constant 0 : index
    %c0_29 = arith.constant 0 : index
    %85 = vector.load %arg4[%c0_28, %c0_29] : memref<32x32xf32, #tpu.memory_space<vmem>>, vector<32x32xf32>
    %cst_30 = arith.constant 0.000000e+00 : f32
    %86 = vector.broadcast %cst_30 : f32 to vector<16x32xf32>
    %87 = vector.extract_strided_slice %82 {offsets = [0, 0], sizes = [16, 8], strides = [1, 1]} : vector<16x32xf32> to vector<16x8xf32>
    %88 = vector.extract_strided_slice %83 {offsets = [0, 0], sizes = [16, 8], strides = [1, 1]} : vector<16x32xf32> to vector<16x8xf32>
    %89 = vector.extract_strided_slice %84 {offsets = [0, 0], sizes = [16, 8], strides = [1, 1]} : vector<16x32xf32> to vector<16x8xf32>
    %90 = tpu.transpose %88, [1, 0] : vector<16x8xf32> -> vector<8x16xf32>
    %cst_31 = arith.constant dense<0.000000e+00> : vector<16x16xf32>
    %91 = tpu.matmul %87, %90, %cst_31 {dimension_numbers = #tpu.dot_dimension_numbers<[1], [0], [0], [1], [0, 0, 1, 1], [], []>} : vector<16x8xf32>, vector<8x16xf32>, vector<16x16xf32> -> vector<16x16xf32>
    %92 = arith.addf %91, %50 : vector<16x16xf32>
    %cst_32 = arith.constant dense<0xFF800000> : vector<16xf32>
    %93 = vector.multi_reduction <maximumf>, %92, %cst_32 [1] : vector<16x16xf32> to vector<16xf32>
    %94 = vector.shape_cast %93 : vector<16xf32> to vector<16x1xf32>
    %95 = vector.broadcast %94 : vector<16x1xf32> to vector<16x16xf32>
    %96 = arith.subf %92, %95 : vector<16x16xf32>
    %97 = math.exp %96 : vector<16x16xf32>
    %cst_33 = arith.constant dense<0.000000e+00> : vector<16xf32>
    %98 = vector.multi_reduction <add>, %97, %cst_33 [1] : vector<16x16xf32> to vector<16xf32>
    %99 = vector.shape_cast %98 : vector<16xf32> to vector<16x1xf32>
    %100 = tpu.reciprocal %99 {approx = true} : vector<16x1xf32> -> vector<16x1xf32>
    %101 = vector.broadcast %100 : vector<16x1xf32> to vector<16x16xf32>
    %102 = arith.mulf %97, %101 : vector<16x16xf32>
    %cst_34 = arith.constant dense<0.000000e+00> : vector<16x8xf32>
    %103 = tpu.matmul %102, %89, %cst_34 {dimension_numbers = #tpu.dot_dimension_numbers<[1], [0], [0], [1], [0, 0, 1, 1], [], []>} : vector<16x16xf32>, vector<16x8xf32>, vector<16x8xf32> -> vector<16x8xf32>
    %104 = vector.extract_strided_slice %85 {offsets = [0, 0], sizes = [8, 32], strides = [1, 1]} : vector<32x32xf32> to vector<8x32xf32>
    %cst_35 = arith.constant dense<0.000000e+00> : vector<16x32xf32>
    %105 = tpu.matmul %103, %104, %cst_35 {dimension_numbers = #tpu.dot_dimension_numbers<[1], [0], [0], [1], [0, 0, 1, 1], [], []>} : vector<16x8xf32>, vector<8x32xf32>, vector<16x32xf32> -> vector<16x32xf32>
    %106 = arith.addf %86, %105 : vector<16x32xf32>
    %107 = vector.extract_strided_slice %82 {offsets = [0, 8], sizes = [16, 8], strides = [1, 1]} : vector<16x32xf32> to vector<16x8xf32>
    %108 = vector.extract_strided_slice %83 {offsets = [0, 8], sizes = [16, 8], strides = [1, 1]} : vector<16x32xf32> to vector<16x8xf32>
    %109 = vector.extract_strided_slice %84 {offsets = [0, 8], sizes = [16, 8], strides = [1, 1]} : vector<16x32xf32> to vector<16x8xf32>
    %110 = tpu.transpose %108, [1, 0] : vector<16x8xf32> -> vector<8x16xf32>
    %cst_36 = arith.constant dense<0.000000e+00> : vector<16x16xf32>
    %111 = tpu.matmul %107, %110, %cst_36 {dimension_numbers = #tpu.dot_dimension_numbers<[1], [0], [0], [1], [0, 0, 1, 1], [], []>} : vector<16x8xf32>, vector<8x16xf32>, vector<16x16xf32> -> vector<16x16xf32>
    %112 = arith.addf %111, %50 : vector<16x16xf32>
    %cst_37 = arith.constant dense<0xFF800000> : vector<16xf32>
    %113 = vector.multi_reduction <maximumf>, %112, %cst_37 [1] : vector<16x16xf32> to vector<16xf32>
    %114 = vector.shape_cast %113 : vector<16xf32> to vector<16x1xf32>
    %115 = vector.broadcast %114 : vector<16x1xf32> to vector<16x16xf32>
    %116 = arith.subf %112, %115 : vector<16x16xf32>
    %117 = math.exp %116 : vector<16x16xf32>
    %cst_38 = arith.constant dense<0.000000e+00> : vector<16xf32>
    %118 = vector.multi_reduction <add>, %117, %cst_38 [1] : vector<16x16xf32> to vector<16xf32>
    %119 = vector.shape_cast %118 : vector<16xf32> to vector<16x1xf32>
    %120 = tpu.reciprocal %119 {approx = true} : vector<16x1xf32> -> vector<16x1xf32>
    %121 = vector.broadcast %120 : vector<16x1xf32> to vector<16x16xf32>
    %122 = arith.mulf %117, %121 : vector<16x16xf32>
    %cst_39 = arith.constant dense<0.000000e+00> : vector<16x8xf32>
    %123 = tpu.matmul %122, %109, %cst_39 {dimension_numbers = #tpu.dot_dimension_numbers<[1], [0], [0], [1], [0, 0, 1, 1], [], []>} : vector<16x16xf32>, vector<16x8xf32>, vector<16x8xf32> -> vector<16x8xf32>
    %124 = vector.extract_strided_slice %85 {offsets = [8, 0], sizes = [8, 32], strides = [1, 1]} : vector<32x32xf32> to vector<8x32xf32>
    %cst_40 = arith.constant dense<0.000000e+00> : vector<16x32xf32>
    %125 = tpu.matmul %123, %124, %cst_40 {dimension_numbers = #tpu.dot_dimension_numbers<[1], [0], [0], [1], [0, 0, 1, 1], [], []>} : vector<16x8xf32>, vector<8x32xf32>, vector<16x32xf32> -> vector<16x32xf32>
    %126 = arith.addf %106, %125 : vector<16x32xf32>
    %127 = vector.extract_strided_slice %82 {offsets = [0, 16], sizes = [16, 8], strides = [1, 1]} : vector<16x32xf32> to vector<16x8xf32>
    %128 = vector.extract_strided_slice %83 {offsets = [0, 16], sizes = [16, 8], strides = [1, 1]} : vector<16x32xf32> to vector<16x8xf32>
    %129 = vector.extract_strided_slice %84 {offsets = [0, 16], sizes = [16, 8], strides = [1, 1]} : vector<16x32xf32> to vector<16x8xf32>
    %130 = tpu.transpose %128, [1, 0] : vector<16x8xf32> -> vector<8x16xf32>
    %cst_41 = arith.constant dense<0.000000e+00> : vector<16x16xf32>
    %131 = tpu.matmul %127, %130, %cst_41 {dimension_numbers = #tpu.dot_dimension_numbers<[1], [0], [0], [1], [0, 0, 1, 1], [], []>} : vector<16x8xf32>, vector<8x16xf32>, vector<16x16xf32> -> vector<16x16xf32>
    %132 = arith.addf %131, %50 : vector<16x16xf32>
    %cst_42 = arith.constant dense<0xFF800000> : vector<16xf32>
    %133 = vector.multi_reduction <maximumf>, %132, %cst_42 [1] : vector<16x16xf32> to vector<16xf32>
    %134 = vector.shape_cast %133 : vector<16xf32> to vector<16x1xf32>
    %135 = vector.broadcast %134 : vector<16x1xf32> to vector<16x16xf32>
    %136 = arith.subf %132, %135 : vector<16x16xf32>
    %137 = math.exp %136 : vector<16x16xf32>
    %cst_43 = arith.constant dense<0.000000e+00> : vector<16xf32>
    %138 = vector.multi_reduction <add>, %137, %cst_43 [1] : vector<16x16xf32> to vector<16xf32>
    %139 = vector.shape_cast %138 : vector<16xf32> to vector<16x1xf32>
    %140 = tpu.reciprocal %139 {approx = true} : vector<16x1xf32> -> vector<16x1xf32>
    %141 = vector.broadcast %140 : vector<16x1xf32> to vector<16x16xf32>
    %142 = arith.mulf %137, %141 : vector<16x16xf32>
    %cst_44 = arith.constant dense<0.000000e+00> : vector<16x8xf32>
    %143 = tpu.matmul %142, %129, %cst_44 {dimension_numbers = #tpu.dot_dimension_numbers<[1], [0], [0], [1], [0, 0, 1, 1], [], []>} : vector<16x16xf32>, vector<16x8xf32>, vector<16x8xf32> -> vector<16x8xf32>
    %144 = vector.extract_strided_slice %85 {offsets = [16, 0], sizes = [8, 32], strides = [1, 1]} : vector<32x32xf32> to vector<8x32xf32>
    %cst_45 = arith.constant dense<0.000000e+00> : vector<16x32xf32>
    %145 = tpu.matmul %143, %144, %cst_45 {dimension_numbers = #tpu.dot_dimension_numbers<[1], [0], [0], [1], [0, 0, 1, 1], [], []>} : vector<16x8xf32>, vector<8x32xf32>, vector<16x32xf32> -> vector<16x32xf32>
    %146 = arith.addf %126, %145 : vector<16x32xf32>
    %147 = vector.extract_strided_slice %82 {offsets = [0, 24], sizes = [16, 8], strides = [1, 1]} : vector<16x32xf32> to vector<16x8xf32>
    %148 = vector.extract_strided_slice %83 {offsets = [0, 24], sizes = [16, 8], strides = [1, 1]} : vector<16x32xf32> to vector<16x8xf32>
    %149 = vector.extract_strided_slice %84 {offsets = [0, 24], sizes = [16, 8], strides = [1, 1]} : vector<16x32xf32> to vector<16x8xf32>
    %150 = tpu.transpose %148, [1, 0] : vector<16x8xf32> -> vector<8x16xf32>
    %cst_46 = arith.constant dense<0.000000e+00> : vector<16x16xf32>
    %151 = tpu.matmul %147, %150, %cst_46 {dimension_numbers = #tpu.dot_dimension_numbers<[1], [0], [0], [1], [0, 0, 1, 1], [], []>} : vector<16x8xf32>, vector<8x16xf32>, vector<16x16xf32> -> vector<16x16xf32>
    %152 = arith.addf %151, %50 : vector<16x16xf32>
    %cst_47 = arith.constant dense<0xFF800000> : vector<16xf32>
    %153 = vector.multi_reduction <maximumf>, %152, %cst_47 [1] : vector<16x16xf32> to vector<16xf32>
    %154 = vector.shape_cast %153 : vector<16xf32> to vector<16x1xf32>
    %155 = vector.broadcast %154 : vector<16x1xf32> to vector<16x16xf32>
    %156 = arith.subf %152, %155 : vector<16x16xf32>
    %157 = math.exp %156 : vector<16x16xf32>
    %cst_48 = arith.constant dense<0.000000e+00> : vector<16xf32>
    %158 = vector.multi_reduction <add>, %157, %cst_48 [1] : vector<16x16xf32> to vector<16xf32>
    %159 = vector.shape_cast %158 : vector<16xf32> to vector<16x1xf32>
    %160 = tpu.reciprocal %159 {approx = true} : vector<16x1xf32> -> vector<16x1xf32>
    %161 = vector.broadcast %160 : vector<16x1xf32> to vector<16x16xf32>
    %162 = arith.mulf %157, %161 : vector<16x16xf32>
    %cst_49 = arith.constant dense<0.000000e+00> : vector<16x8xf32>
    %163 = tpu.matmul %162, %149, %cst_49 {dimension_numbers = #tpu.dot_dimension_numbers<[1], [0], [0], [1], [0, 0, 1, 1], [], []>} : vector<16x16xf32>, vector<16x8xf32>, vector<16x8xf32> -> vector<16x8xf32>
    %164 = vector.extract_strided_slice %85 {offsets = [24, 0], sizes = [8, 32], strides = [1, 1]} : vector<32x32xf32> to vector<8x32xf32>
    %cst_50 = arith.constant dense<0.000000e+00> : vector<16x32xf32>
    %165 = tpu.matmul %163, %164, %cst_50 {dimension_numbers = #tpu.dot_dimension_numbers<[1], [0], [0], [1], [0, 0, 1, 1], [], []>} : vector<16x8xf32>, vector<8x32xf32>, vector<16x32xf32> -> vector<16x32xf32>
    %166 = arith.addf %146, %165 : vector<16x32xf32>
    %167 = vector.shape_cast %6 : vector<32xf32> to vector<1x32xf32>
    %168 = vector.broadcast %167 : vector<1x32xf32> to vector<16x32xf32>
    %169 = arith.addf %166, %168 : vector<16x32xf32>
    %170 = arith.addf %0, %169 : vector<16x32xf32>
    %cst_51 = arith.constant dense<0.000000e+00> : vector<16xf32>
    %171 = vector.multi_reduction <add>, %170, %cst_51 [1] : vector<16x32xf32> to vector<16xf32>
    %172 = vector.shape_cast %171 : vector<16xf32> to vector<16x1xf32>
    %cst_52 = arith.constant 3.200000e+01 : f32
    %173 = vector.broadcast %cst_52 : f32 to vector<16x1xf32>
    %174 = arith.divf %172, %173 : vector<16x1xf32>
    %175 = vector.broadcast %174 : vector<16x1xf32> to vector<16x32xf32>
    %176 = arith.subf %170, %175 : vector<16x32xf32>
    %177 = arith.mulf %176, %176 : vector<16x32xf32>
    %cst_53 = arith.constant dense<0.000000e+00> : vector<16xf32>
    %178 = vector.multi_reduction <add>, %177, %cst_53 [1] : vector<16x32xf32> to vector<16xf32>
    %179 = vector.shape_cast %178 : vector<16xf32> to vector<16x1xf32>
    %cst_54 = arith.constant 3.200000e+01 : f32
    %180 = vector.broadcast %cst_54 : f32 to vector<16x1xf32>
    %181 = arith.divf %179, %180 : vector<16x1xf32>
    %182 = vector.broadcast %174 : vector<16x1xf32> to vector<16x32xf32>
    %183 = arith.subf %170, %182 : vector<16x32xf32>
    %cst_55 = arith.constant 9.99999974E-6 : f32
    %184 = vector.broadcast %cst_55 : f32 to vector<16x1xf32>
    %185 = arith.addf %181, %184 : vector<16x1xf32>
    %186 = math.rsqrt %185 : vector<16x1xf32>
    %187 = vector.broadcast %186 : vector<16x1xf32> to vector<16x32xf32>
    %188 = arith.mulf %183, %187 : vector<16x32xf32>
    %189 = vector.shape_cast %8 : vector<32xf32> to vector<1x32xf32>
    %190 = vector.broadcast %189 : vector<1x32xf32> to vector<16x32xf32>
    %191 = arith.mulf %188, %190 : vector<16x32xf32>
    %192 = vector.shape_cast %10 : vector<32xf32> to vector<1x32xf32>
    %193 = vector.broadcast %192 : vector<1x32xf32> to vector<16x32xf32>
    %194 = arith.addf %191, %193 : vector<16x32xf32>
    %c0_56 = arith.constant 0 : index
    %c0_57 = arith.constant 0 : index
    %195 = vector.load %arg5[%c0_56, %c0_57] : memref<32x128xf32, #tpu.memory_space<vmem>>, vector<32x128xf32>
    %cst_58 = arith.constant dense<0.000000e+00> : vector<16x128xf32>
    %196 = tpu.matmul %194, %195, %cst_58 {dimension_numbers = #tpu.dot_dimension_numbers<[1], [0], [0], [1], [0, 0, 1, 1], [], []>} : vector<16x32xf32>, vector<32x128xf32>, vector<16x128xf32> -> vector<16x128xf32>
    %c0_59 = arith.constant 0 : index
    %c0_60 = arith.constant 0 : index
    %197 = vector.load %arg6[%c0_59, %c0_60] : memref<1x128xf32, #tpu.memory_space<vmem>>, vector<1x128xf32>
    %198 = vector.shape_cast %197 : vector<1x128xf32> to vector<128xf32>
    %199 = vector.shape_cast %198 : vector<128xf32> to vector<1x128xf32>
    %200 = vector.broadcast %199 : vector<1x128xf32> to vector<16x128xf32>
    %201 = arith.addf %196, %200 : vector<16x128xf32>
    %cst_61 = arith.constant 1.702000e+00 : f32
    %202 = vector.broadcast %cst_61 : f32 to vector<16x128xf32>
    %203 = arith.mulf %202, %201 : vector<16x128xf32>
    %204 = arith.negf %203 : vector<16x128xf32>
    %205 = math.exp %204 : vector<16x128xf32>
    %cst_62 = arith.constant 1.000000e+00 : f32
    %206 = vector.broadcast %cst_62 : f32 to vector<16x128xf32>
    %207 = arith.addf %206, %205 : vector<16x128xf32>
    %208 = arith.divf %206, %207 : vector<16x128xf32>
    %209 = arith.mulf %201, %208 : vector<16x128xf32>
    %c0_63 = arith.constant 0 : index
    %c0_64 = arith.constant 0 : index
    %210 = vector.load %arg7[%c0_63, %c0_64] : memref<128x32xf32, #tpu.memory_space<vmem>>, vector<128x32xf32>
    %cst_65 = arith.constant dense<0.000000e+00> : vector<16x32xf32>
    %211 = tpu.matmul %209, %210, %cst_65 {dimension_numbers = #tpu.dot_dimension_numbers<[1], [0], [0], [1], [0, 0, 1, 1], [], []>} : vector<16x128xf32>, vector<128x32xf32>, vector<16x32xf32> -> vector<16x32xf32>
    %212 = vector.shape_cast %12 : vector<32xf32> to vector<1x32xf32>
    %213 = vector.broadcast %212 : vector<1x32xf32> to vector<16x32xf32>
    %214 = arith.addf %211, %213 : vector<16x32xf32>
    %215 = arith.addf %170, %214 : vector<16x32xf32>
    %c0_66 = arith.constant 0 : index
    %c0_67 = arith.constant 0 : index
    %216 = vector.load %arg8[%c0_66, %c0_67] : memref<16x32xf32, #tpu.memory_space<vmem>>, vector<16x32xf32>
    tpu.vector_store %arg8[%c0_66, %c0_67], %215 {strides = array<i32>} : memref<16x32xf32, #tpu.memory_space<vmem>>, vector<16x32xf32>,
    return
  }
}

</mosaic_0001>

<bundles_post_ra>
// kernel: tpu_custom_call.1
= control target key start
LH: loop header
LB: loop body
LE: loop exit
PB: predicated region body
PF: predicated region fallthrough
CT: control target
= control target key end

     0   :  { %vm83_vm0 = vcmask 261120   ;;  %s2414_s0 = inlined_call_operand.vmem [shape: f32[16,32], index: 0, kind: input, shape index: {}]   ;;  %s2415_s1 = inlined_call_operand.vmem [shape: f32[6,32], index: 1, kind: input, shape index: {}]   ;;  %s2416_s2 = inlined_call_operand.vmem [shape: f32[32,96], index: 2, kind: input, shape index: {}]   ;;  %s2417_s3 = inlined_call_operand.vmem [shape: f32[1,96], index: 3, kind: input, shape index: {}]   ;;  %s2418_s4 = inlined_call_operand.vmem [shape: f32[32,32], index: 4, kind: input, shape index: {}]   ;;  %s2419_s5 = inlined_call_operand.vmem [shape: f32[32,128], index: 5, kind: input, shape index: {}]   ;;  %s2420_s6 = inlined_call_operand.vmem [shape: f32[1,128], index: 6, kind: input, shape index: {}]   ;;  %s2421_s7 = inlined_call_operand.vmem [shape: f32[128,32], index: 7, kind: input, shape index: {}]   ;;  %s2422_s8 = inlined_call_operand.hbm [shape: f32[16,32], index: 8, kind: output, shape index: {}]  }
   0x1   :  { %v2153_v0 = vld [vmem:[%s2414_s0] sm:$0xff]  ;;  %v2158_v1 = vld [vmem:[%s2414_s0 + $0x8] sm:$0xff] }
   0x2   :  { %13 = vsyncpa [#allocation3], 0  ;;  %v84_v2 = vsel %vm83_vm0, %v2153_v0, 0.0  ;;  %v87_v3 = vsel %vm83_vm0, %v2158_v1, 0.0  ;;  %v123_v14 = vld [vmem:[%s2416_s2] sm:$0xff]  ;;  %v124_v15 = vld [vmem:[%s2416_s2 + $0x8] sm:$0xff]  ;;  %v38_v47 = vlaneseq }
   0x3   :  { %85 = vadd.xlane.f32.xlu0 %v84_v2  ;;  %v125_v16 = vld [vmem:[%s2416_s2 + $0x10] sm:$0xff]  ;;  %v1869_v17 = vpack.c.bf16 %v124_v15, %v123_v14  ;;  %v126_v18 = vld [vmem:[%s2416_s2 + $0x18] sm:$0xff]  ;;  %v1616_v27 = vld [vmem:[%s2415_s1] ss:$0 sm:$0xff]  ;;  %vm225_vm1 = vcmask 64512   ;;  %s2090_s21 = smov 96  }
   0x4   :  { %v1873_v19 = vpack.c.bf16 %v126_v18, %v125_v16  ;;  %v1617_v29 = vld [vmem:[%s2415_s1 + $0x1] ss:$0 sm:$0xff]  ;;  %v1618_v36 = vld [vmem:[%s2417_s3] ss:$0 sm:$0xff]  ;;  %s2091_s22 = smov 88   ;;  %s2092_s3 = smov 120   ;;  %vm2207_vm2 = vmpackc.low %vm225_vm1, %vm225_vm1 }
   0x5   :  { %1870 = vmatprep.subr.bf16.mxu1 %v1869_v17  ;;  %v39_v48 = vshrl.u32 %v38_v47, 7  ;;  %v66_v49 = vand.u32 127, %v38_v47  ;;  %v2093_v54 = vmov -1e+30   ;;  %vm309_vm5 = vcmask 130048   ;;  %s2094_s23 = smov 64  }
   0x6   :  { %1872 = vmatpush3.bf16.msra.mxu1 %v1869_v17  ;;  %s2095_s24 = smov 56   ;;  %s2096_s25 = smov 112  }
   0x7   :  { %88 = vadd.xlane.f32.xlu0 %v87_v3  ;;  %1874 = vmatprep.subr.bf16.mxu1 %v1873_v19  ;;  %v40_v50 = vadd.s32 8, %v39_v48  ;;  %v71_v51 = vand.u32 1, %v66_v49  ;;  %v45_v52 = vand.u32 1, %v39_v48  ;;  %s2097_s26 = smov 72   ;;  %s2098_s27 = smov 104  }
   0x8   :  { %s2099_s28 = smov 80   ;;  %s2100_s10 = smov 48  }
   0x9   :  { %v52_v53 = vand.u32 1, %v40_v50  ;;  %vm79_vm3 = vcmp.eq.s32.totalorder %v45_v52, %v71_v51  ;;  %s2101_s11 = smov 40  }
   0xa   :  { %1876 = vmatpush3.bf16.msra.mxu1 %v1873_v19  ;;  %v2217_v55 = vsel %vm79_vm3, 0.0, %v2093_v54 }
   0xb   :  { %vm80_vm4 = vcmp.eq.s32.totalorder %v52_v53, %v71_v51 }
   0xc   :  { %v2219_v57 = vsel %vm80_vm4, 0.0, %v2093_v54 }
  0x90   :  { %v86_v4 = vpop.xlane.xlu0 %85 }
  0x91   :  { %v91_v5 = vmul.f32 0.03125, %v86_v4 }
  0x93   :  { %v93_v6 = vsub.f32 %v2153_v0, %v91_v5 }
  0x94   :  { %v89_v7 = vpop.xlane.xlu0 %88 }
  0x95   :  { %v92_v8 = vmul.f32 0.03125, %v89_v7  ;;  %v95_v9 = vmul.f32 %v93_v6, %v93_v6 }
  0x97   :  { %v94_v10 = vsub.f32 %v2158_v1, %v92_v8  ;;  %v97_v11 = vsel %vm83_vm0, %v95_v9, 0.0 }
  0x98   :  { %98 = vadd.xlane.f32.xlu1 %v97_v11 }
  0x99   :  { %v96_v12 = vmul.f32 %v94_v10, %v94_v10 }
  0x9b   :  { %v100_v13 = vsel %vm83_vm0, %v96_v12, 0.0 }
  0x9c   :  { %101 = vadd.xlane.f32.xlu1 %v100_v13 }
 0x125   :  { %v99_v20 = vpop.xlane.xlu1 %98 }
 0x126   :  { %v103_v21 = vmul.f32 0.03125, %v99_v20 }
 0x128   :  { %v105_v22 = vadd.f32 1e-05, %v103_v21 }
 0x129   :  { %v102_v23 = vpop.xlane.xlu1 %101 }
 0x12a   :  { %2018 = vrsqrt.f32 %v105_v22  ;;  %v104_v24 = vmul.f32 0.03125, %v102_v23 }
 0x12c   :  { %v106_v25 = vadd.f32 1e-05, %v104_v24 }
 0x12e   :  { %2020 = vrsqrt.f32 %v106_v25 }
 0x134   :  { %v2019_v26 = vpop.eup %2018 }
 0x135   :  { %v109_v28 = vmul.f32 %v2019_v26, %v93_v6 }
 0x137   :  { %v115_v30 = vmul.f32 %v1616_v27, %v109_v28 }
 0x138   :  { %v2021_v31 = vpop.eup %2020 }
 0x139   :  { %v110_v32 = vmul.f32 %v2021_v31, %v94_v10  ;;  %v121_v33 = vadd.f32 %v1617_v29, %v115_v30 }
 0x13b   :  { %v116_v34 = vmul.f32 %v1616_v27, %v110_v32  ;;  %1744 = vmatprep.mubr.msk.f32.mxu1 %vm83_vm0, %v121_v33 }
 0x13d   :  { %v122_v35 = vadd.f32 %v1617_v29, %v116_v34 }
 0x13f   :  { %1745 = vmatmul.mubr.msk.f32.vlgmr.msra.gmra.mrb[0].mxu1 %vm83_vm0, %v122_v35 }
 0x212   :  { %v1746_v37 = vpop.f32.mrb[0].mxu1 }
 0x213   :  { %v2191_v38 = vadd.f32 %v1746_v37, %v1618_v36  ;;  %v206_v39 = vpop.f32.mrb[1].mxu1 }
 0x214   :  { %v2193_v40 = vadd.f32 %v1618_v36, %v206_v39 }
 0x216   :  { %1751 = vmatprep.mubr.msk.f32.mxu1 %vm225_vm1, %v2193_v40  ;;  %v2199_v41 = vpack.i.bf16 %v2191_v38, %v2193_v40 }
 0x218   :  { %1979 = vrot.lane.b32.xlu0 %v2199_v41, %s2090_s21 }
 0x21c   :  { %1989 = vrot.lane.b32.xlu0 %v2199_v41, %s2091_s22 }
 0x220   :  { %419 = vrot.lane.b32.xlu0 %v2193_v40, %s2092_s3 }
 0x224   :  { %421 = vrot.lane.b32.xlu0 %v2191_v38, %s2092_s3 }
 0x28a   :  { %v1980_v42 = vpop.permute.xlu0 %1979 }
 0x28b   :  { %v1982_v43 = vunpack.i.h.bf16 %v1980_v42  ;;  %v1981_v44 = vunpack.i.l.bf16 %v1980_v42 }
 0x28d   :  { %v1877_v46 = vpack.c.bf16 %v1982_v43, %v1981_v44 }
 0x28e   :  { %v1990_v13 = vpop.permute.xlu0 %1989 }
 0x28f   :  { %1879 = vmatprep.subr.msk.bf16.mxu1 %vm2207_vm2, %v1877_v46  ;;  %v1992_v15 = vunpack.i.h.bf16 %v1990_v13  ;;  %v1991_v16 = vunpack.i.l.bf16 %v1990_v13 }
 0x290   :  { %1882 = vmatpush3.bf16.xpose.msk.msra.mxu1 %vm2207_vm2, %v1877_v46 }
 0x291   :  { %v1887_v20 = vpack.c.bf16 %v1992_v15, %v1991_v16 }
 0x292   :  { %v420_v25 = vpop.permute.xlu0 %419 }
 0x296   :  { %v422_v26 = vpop.permute.xlu0 %421 }
 0x297   :  { %1752 = vmatmul.mubr.msk.f32.vlgmr.msra.gmra.mrb[2].mxu1 %vm225_vm1, %v2191_v38 }
 0x36a   :  { %v1753_v56 = vpop.f32.mrb[2].mxu1 }
 0x36b   :  { %v300_v58 = vpop.f32.mrb[3].mxu1  ;;  %v306_v60 = vadd.f32 %v1753_v56, %v2219_v57 }
 0x36c   :  { %v301_v59 = vadd.f32 %v300_v58, %v2217_v55 }
 0x36d   :  { %v313_v62 = vsel %vm309_vm5, %v306_v60, -inf }
 0x36e   :  { %v310_v61 = vsel %vm309_vm5, %v301_v59, -inf }
 0x36f   :  { %311 = vmax.xlane.f32.xlu1 %v310_v61 }
 0x373   :  { %314 = vmax.xlane.f32.xlu1 %v313_v62 }
 0x3fc   :  { %v312_v63 = vpop.xlane.xlu1 %311 }
 0x3fd   :  { %v316_v2 = vsub.f32 %v301_v59, %v312_v63 }
 0x3ff   :  { %v318_v5 = vmul.f32 1.442695, %v316_v2 }
 0x400   :  { %v315_v3 = vpop.xlane.xlu1 %314 }
 0x401   :  { %v317_v4 = vsub.f32 %v306_v60, %v315_v3 }
 0x403   :  { %v320_v6 = vmul.f32 1.442695, %v317_v4 }
 0x405   :  { %2022 = vpow2.f32 %v320_v6 }
 0x406   :  { %2024 = vpow2.f32 %v318_v5 }
 0x40f   :  { %v2023_v7 = vpop.eup %2022 }
 0x410   :  { %v325_v8 = vsel %vm309_vm5, %v2023_v7, 0.0  ;;  %v2025_v9 = vpop.eup %2024 }
 0x411   :  { %326 = vadd.xlane.f32.xlu1 %v325_v8  ;;  %v322_v10 = vsel %vm309_vm5, %v2025_v9, 0.0 }
 0x415   :  { %323 = vadd.xlane.f32.xlu1 %v322_v10  ;;  %v215_v10 = vld [vmem:[%s2418_s4] sm:$0xff] }
 0x426   :  { %1984 = vrot.lane.b32.xlu1 %v2199_v41, %s2094_s23 }
 0x49e   :  { %v327_v11 = vpop.xlane.xlu1 %326 }
 0x49f   :  { %2026 = vrcp.f32 %v327_v11 }
 0x4a2   :  { %v324_v12 = vpop.xlane.xlu1 %323 }
 0x4a3   :  { %2028 = vrcp.f32 %v324_v12 }
 0x4a6   :  { %v1985_v14 = vpop.permute.xlu1 %1984 }
 0x4a7   :  { %v1987_v17 = vunpack.i.h.bf16 %v1985_v14  ;;  %v1986_v18 = vunpack.i.l.bf16 %v1985_v14 }
 0x4a9   :  { %v1883_v19 = vpack.c.bf16 %v1987_v17, %v1986_v18  ;;  %v2027_v21 = vpop.eup %2026 }
 0x4aa   :  { %v331_v24 = vmul.f32 %v2027_v21, %v2023_v7 }
 0x4ab   :  { %1884 = vmatprep.subr.bf16.mxu1 %v1883_v19 }
 0x4ac   :  { %1886 = vmatpush3.bf16.msra.mxu1 %v1883_v19 }
 0x4ad   :  { %v2029_v22 = vpop.eup %2028  ;;  %1889 = vmatprep.subr.msk.bf16.mxu1 %vm2207_vm2, %v1887_v20 }
 0x4ae   :  { %v330_v23 = vmul.f32 %v2029_v22, %v2025_v9  ;;  %v216_v9 = vld [vmem:[%s2418_s4 + $0x8] sm:$0xff] }
 0x4af   :  { %1775 = vmatprep.subr.mxu0 %v216_v9 }
 0x4b0   :  { %1758 = vmatprep.mubr.msk.f32.mxu1 %vm309_vm5, %v330_v23  ;;  %1776 = vmatpush3.msra.mxu0 %v216_v9  ;;  %v1653_v9 = vld [vmem:[%s2415_s1 + $0x2] ss:$0 sm:$0xff] }
 0x4b1   :  { %1759 = vmatmul.mubr.msk.f32.vlgmr.msra.gmra.mrb[4].mxu1 %vm309_vm5, %v331_v24  ;;  %1780 = vmatprep.subr.mxu0 %v215_v10 }
 0x4b2   :  { %1765 = vmatprep.mubr.msk.f32.mxu1 %vm225_vm1, %v420_v25 }
 0x4b5   :  { %1892 = vmatpush3.bf16.xpose.msk.msra.mxu1 %vm2207_vm2, %v1887_v20 }
 0x4bc   :  { %1766 = vmatmul.mubr.msk.f32.vlgmr.msra.gmra.mrb[6].mxu1 %vm225_vm1, %v422_v26 }
 0x584   :  { %v2236_v27 = vpop.f32.mrb[4].mxu1 }
 0x585   :  { %v2238_v28 = vpop.f32.mrb[5].mxu1 }
 0x58f   :  { %v1767_v29 = vpop.f32.mrb[6].mxu1 }
 0x590   :  { %v507_v30 = vadd.f32 %v1767_v29, %v2219_v57  ;;  %v501_v31 = vpop.f32.mrb[7].mxu1 }
 0x591   :  { %v502_v32 = vadd.f32 %v501_v31, %v2217_v55 }
 0x592   :  { %v513_v33 = vsel %vm309_vm5, %v507_v30, -inf }
 0x593   :  { %514 = vmax.xlane.f32.xlu0 %v513_v33  ;;  %v510_v34 = vsel %vm309_vm5, %v502_v32, -inf }
 0x594   :  { %511 = vmax.xlane.f32.xlu1 %v510_v34 }
 0x5a5   :  { %1994 = vrot.lane.b32.xlu1 %v2199_v41, %s2095_s24 }
 0x5a9   :  { %781 = vrot.lane.b32.xlu1 %v2193_v40, %s2096_s25 }
 0x5ad   :  { %783 = vrot.lane.b32.xlu1 %v2191_v38, %s2096_s25 }
 0x5b1   :  { %2004 = vrot.lane.b32.xlu1 %v2199_v41, %s2097_s26 }
 0x5b5   :  { %1066 = vrot.lane.b32.xlu1 %v2191_v38, %s2098_s27 }
 0x620   :  { %v515_v35 = vpop.xlane.xlu0 %514 }
 0x621   :  { %v517_v36 = vsub.f32 %v507_v30, %v515_v35  ;;  %v512_v37 = vpop.xlane.xlu1 %511 }
 0x622   :  { %v516_v39 = vsub.f32 %v502_v32, %v512_v37 }
 0x623   :  { %v520_v42 = vmul.f32 1.442695, %v517_v36 }
 0x624   :  { %v518_v43 = vmul.f32 1.442695, %v516_v39 }
 0x625   :  { %2030 = vpow2.f32 %v520_v42  ;;  %v1995_v44 = vpop.permute.xlu1 %1994 }
 0x626   :  { %v1997_v46 = vunpack.i.h.bf16 %v1995_v44  ;;  %v1996_v47 = vunpack.i.l.bf16 %v1995_v44  ;;  %2032 = vpow2.f32 %v518_v43 }
 0x628   :  { %v1893_v48 = vpack.c.bf16 %v1997_v46, %v1996_v47 }
 0x629   :  { %v782_v52 = vpop.permute.xlu1 %781 }
 0x62a   :  { %1894 = vmatprep.subr.bf16.mxu1 %v1893_v48 }
 0x62b   :  { %1896 = vmatpush3.bf16.msra.mxu1 %v1893_v48 }
 0x62d   :  { %v784_v56 = vpop.permute.xlu1 %783 }
 0x62f   :  { %v2031_v49 = vpop.eup %2030 }
 0x630   :  { %v525_v50 = vsel %vm309_vm5, %v2031_v49, 0.0  ;;  %v2033_v51 = vpop.eup %2032 }
 0x631   :  { %526 = vadd.xlane.f32.xlu0 %v525_v50  ;;  %v522_v38 = vsel %vm309_vm5, %v2033_v51, 0.0  ;;  %v2005_v62 = vpop.permute.xlu1 %2004 }
 0x632   :  { %v2007_v3 = vunpack.i.h.bf16 %v2005_v62  ;;  %v2006_v4 = vunpack.i.l.bf16 %v2005_v62 }
 0x634   :  { %v1907_v6 = vpack.c.bf16 %v2007_v3, %v2006_v4 }
 0x635   :  { %523 = vadd.xlane.f32.xlu0 %v522_v38  ;;  %v1067_v8 = vpop.permute.xlu1 %1066  ;;  %v217_v38 = vld [vmem:[%s2418_s4 + $0x10] sm:$0xff] }
 0x64b   :  { %1999 = vrot.lane.b32.xlu0 %v2199_v41, %s2099_s28 }
 0x64f   :  { %1064 = vrot.lane.b32.xlu0 %v2193_v40, %s2098_s27 }
 0x6be   :  { %v527_v53 = vpop.xlane.xlu0 %526 }
 0x6bf   :  { %2034 = vrcp.f32 %v527_v53 }
 0x6c2   :  { %v524_v54 = vpop.xlane.xlu0 %523 }
 0x6c3   :  { %2036 = vrcp.f32 %v524_v54 }
 0x6c6   :  { %v2000_v58 = vpop.permute.xlu0 %1999 }
 0x6c7   :  { %v2002_v59 = vunpack.i.h.bf16 %v2000_v58  ;;  %v2001_v60 = vunpack.i.l.bf16 %v2000_v58 }
 0x6c9   :  { %v1897_v61 = vpack.c.bf16 %v2002_v59, %v2001_v60  ;;  %v2035_v63 = vpop.eup %2034 }
 0x6ca   :  { %v531_v40 = vmul.f32 %v2035_v63, %v2031_v49  ;;  %v1065_v7 = vpop.permute.xlu0 %1064 }
 0x6cb   :  { %1899 = vmatprep.subr.msk.bf16.mxu1 %vm2207_vm2, %v1897_v61 }
 0x6cd   :  { %v2037_v2 = vpop.eup %2036 }
 0x6ce   :  { %v530_v5 = vmul.f32 %v2037_v2, %v2033_v51 }
 0x6d0   :  { %1772 = vmatprep.mubr.msk.f32.mxu1 %vm309_vm5, %v530_v5 }
 0x6d1   :  { %1773 = vmatmul.mubr.msk.f32.vlgmr.msra.gmra.mrb[8].mxu1 %vm309_vm5, %v531_v40  ;;  %v218_v40 = vld [vmem:[%s2418_s4 + $0x18] sm:$0xff] }
 0x6d2   :  { %1902 = vmatpush3.bf16.xpose.msk.msra.mxu1 %vm2207_vm2, %v1897_v61  ;;  %1789 = vmatprep.mubr.msk.f32.mxu1 %vm225_vm1, %v782_v52 }
 0x6d3   :  { %1909 = vmatprep.subr.msk.bf16.mxu1 %vm2207_vm2, %v1907_v6 }
 0x6d9   :  { %1790 = vmatmul.mubr.msk.f32.vlgmr.msra.gmra.mrb[10].mxu1 %vm225_vm1, %v784_v56 }
 0x6da   :  { %1912 = vmatpush3.bf16.xpose.msk.msra.mxu1 %vm2207_vm2, %v1907_v6  ;;  %1808 = vmatprep.mubr.msk.f32.mxu1 %vm225_vm1, %v1065_v7 }
 0x6e1   :  { %1809 = vmatmul.mubr.msk.f32.vlgmr.msra.gmra.mrb[12].mxu1 %vm225_vm1, %v1067_v8 }
 0x7a4   :  { %v1774_v11 = vpop.f32.mrb[8].mxu1 }
 0x7a5   :  { %v610_v12 = vpop.f32.mrb[9].mxu1 }
 0x7a6   :  { %1777 = vmatprep.mubr.msk.f32.mxu0 %vm225_vm1, %v610_v12 }
 0x7a7   :  { %1778 = vmatmul.mubr.msk.f32.vlgmr.msra.gmra.mrb[0].mxu0 %vm225_vm1, %v1774_v11 }
 0x7a8   :  { %1782 = vmatprep.mubr.msk.f32.mxu0 %vm225_vm1, %v2238_v28  ;;  %1781 = vmatpush3.msra.mxu0 %v215_v10 }
 0x7ac   :  { %v1791_v45 = vpop.f32.mrb[10].mxu1 }
 0x7ad   :  { %v869_v13 = vadd.f32 %v1791_v45, %v2219_v57  ;;  %v863_v14 = vpop.f32.mrb[11].mxu1 }
 0x7ae   :  { %v864_v15 = vadd.f32 %v863_v14, %v2217_v55 }
 0x7af   :  { %v875_v16 = vsel %vm309_vm5, %v869_v13, -inf  ;;  %1783 = vmatmul.mubr.msk.f32.vlgmr.msra.gmra.mrb[0].mxu0 %vm225_vm1, %v2236_v27 }
 0x7b0   :  { %876 = vmax.xlane.f32.xlu1 %v875_v16  ;;  %v872_v17 = vsel %vm309_vm5, %v864_v15, -inf }
 0x7b1   :  { %873 = vmax.xlane.f32.xlu0 %v872_v17 }
 0x7b4   :  { %v1810_v18 = vpop.f32.mrb[12].mxu1 }
 0x7b5   :  { %v1146_v19 = vpop.f32.mrb[13].mxu1  ;;  %v1152_v21 = vadd.f32 %v1810_v18, %v2219_v57 }
 0x7b6   :  { %v1147_v20 = vadd.f32 %v1146_v19, %v2217_v55 }
 0x7b7   :  { %v1158_v23 = vsel %vm309_vm5, %v1152_v21, -inf }
 0x7b8   :  { %v1155_v22 = vsel %vm309_vm5, %v1147_v20, -inf }
 0x7b9   :  { %1156 = vmax.xlane.f32.xlu1 %v1155_v22 }
 0x7bd   :  { %1159 = vmax.xlane.f32.xlu1 %v1158_v23 }
 0x83d   :  { %v877_v24 = vpop.xlane.xlu1 %876 }
 0x83e   :  { %v879_v25 = vsub.f32 %v869_v13, %v877_v24  ;;  %v874_v26 = vpop.xlane.xlu0 %873 }
 0x83f   :  { %v878_v27 = vsub.f32 %v864_v15, %v874_v26  ;;  %v1394_v26 = vld [vmem:[%s2419_s5 + $0x8] sm:$0xff] }
 0x840   :  { %v882_v28 = vmul.f32 1.442695, %v879_v25  ;;  %v1393_v25 = vld [vmem:[%s2419_s5] sm:$0xff] }
 0x841   :  { %v880_v29 = vmul.f32 1.442695, %v878_v27  ;;  %v1917_v27 = vpack.c.bf16 %v1394_v26, %v1393_v25  ;;  %v1661_v26 = vld [vmem:[%s2415_s1 + $0x5] ss:$0 sm:$0xff] }
 0x842   :  { %2038 = vpow2.f32 %v882_v28  ;;  %v1395_v28 = vld [vmem:[%s2419_s5 + $0x10] sm:$0xff] }
 0x843   :  { %2040 = vpow2.f32 %v880_v29  ;;  %1918 = vmatprep.subr.bf16.mxu1 %v1917_v27  ;;  %v1396_v29 = vld [vmem:[%s2419_s5 + $0x18] sm:$0xff] }
 0x844   :  { %1920 = vmatpush3.bf16.msra.mxu1 %v1917_v27 }
 0x846   :  { %v1157_v30 = vpop.xlane.xlu1 %1156 }
 0x847   :  { %v1161_v31 = vsub.f32 %v1147_v20, %v1157_v30  ;;  %v1921_v30 = vpack.c.bf16 %v1396_v29, %v1395_v28 }
 0x849   :  { %v1163_v57 = vmul.f32 1.442695, %v1161_v31  ;;  %1922 = vmatprep.subr.bf16.mxu1 %v1921_v30 }
 0x84a   :  { %v1160_v32 = vpop.xlane.xlu1 %1159  ;;  %1924 = vmatpush3.bf16.msra.mxu1 %v1921_v30 }
 0x84b   :  { %v1162_v55 = vsub.f32 %v1152_v21, %v1160_v32 }
 0x84c   :  { %v2039_v33 = vpop.eup %2038 }
 0x84d   :  { %v1165_v34 = vmul.f32 1.442695, %v1162_v55  ;;  %v887_v35 = vsel %vm309_vm5, %v2039_v33, 0.0  ;;  %v2041_v36 = vpop.eup %2040 }
 0x84e   :  { %888 = vadd.xlane.f32.xlu0 %v887_v35  ;;  %v884_v37 = vsel %vm309_vm5, %v2041_v36, 0.0 }
 0x84f   :  { %2042 = vpow2.f32 %v1165_v34 }
 0x850   :  { %2044 = vpow2.f32 %v1163_v57 }
 0x852   :  { %885 = vadd.xlane.f32.xlu0 %v884_v37 }
 0x859   :  { %v2043_v39 = vpop.eup %2042 }
 0x85a   :  { %v1170_v42 = vsel %vm309_vm5, %v2043_v39, 0.0  ;;  %v2045_v43 = vpop.eup %2044 }
 0x85b   :  { %1171 = vadd.xlane.f32.xlu1 %v1170_v42  ;;  %v1167_v44 = vsel %vm309_vm5, %v2045_v43, 0.0 }
 0x85f   :  { %1168 = vadd.xlane.f32.xlu1 %v1167_v44 }
 0x868   :  { %2009 = vrot.lane.b32.xlu0 %v2199_v41, %s2100_s10  ;;  %s2102_s10 = smov [#allocation2]  }
 0x870   :  { %2014 = vrot.lane.b32.xlu1 %v2199_v41, %s2101_s11  ;;  %s1605_s11 = sshll.u32 %s2102_s10, 4  ;;  %s1606_s11 = int_to_ptr.vmem [resolvable:$true] %s1605_s11 }
 0x871   :  { %s2066_s12 = scalar_lea.vmem %s1606_s11, 256  ;;  %p2071_p1 = scmp.lt.s32.totalorder %s1606_s11, %s1606_s11 }
 0x872   :  { %p2067_p0 = scmp.ne.s32.totalorder %s1606_s11, %s2066_s12  ;;  %p2072_p2 = scmp.lt.s32.totalorder %s2066_s12, %s2066_s12 }
 0x874   :  { %p2073_p3 = por %p2072_p2, %p2071_p1 }
 0x876   :  { %p2074_p4 = pnand %p2073_p3, %p2067_p0 }
 0x8db   :  { %v889_v46 = vpop.xlane.xlu0 %888 }
 0x8dc   :  { %2046 = vrcp.f32 %v889_v46 }
 0x8df   :  { %v886_v47 = vpop.xlane.xlu0 %885 }
 0x8e0   :  { %2048 = vrcp.f32 %v886_v47 }
 0x8e3   :  { %v2010_v48 = vpop.permute.xlu0 %2009 }
 0x8e4   :  { %v2012_v49 = vunpack.i.h.bf16 %v2010_v48  ;;  %v2011_v50 = vunpack.i.l.bf16 %v2010_v48 }
 0x8e6   :  { %v1903_v51 = vpack.c.bf16 %v2012_v49, %v2011_v50  ;;  %v2047_v53 = vpop.eup %2046  ;;  %v1501_v49 = vld [vmem:[%s2421_s7] sm:$0xff]  ;;  %v1502_v50 = vld [vmem:[%s2421_s7 + $0x8] sm:$0xff] }
 0x8e7   :  { %v893_v41 = vmul.f32 %v2047_v53, %v2039_v33 }
 0x8e8   :  { %v1172_v52 = vpop.xlane.xlu1 %1171  ;;  %1904 = vmatprep.subr.bf16.mxu0 %v1903_v51 }
 0x8e9   :  { %1906 = vmatpush3.bf16.msra.mxu0 %v1903_v51  ;;  %v1925_v51 = vpack.c.bf16 %v1502_v50, %v1501_v49 }
 0x8ea   :  { %v2049_v54 = vpop.eup %2048  ;;  %1799 = vmatprep.subr.mxu0 %v217_v38 }
 0x8eb   :  { %v892_v56 = vmul.f32 %v2049_v54, %v2041_v36  ;;  %v1654_v36 = vld [vmem:[%s2415_s1 + $0x3] ss:$0 sm:$0xff] }
 0x8ec   :  { %v1169_v58 = vpop.xlane.xlu1 %1168  ;;  %v1505_v54 = vld [vmem:[%s2421_s7 + $0x20] sm:$0xff] }
 0x8ed   :  { %1796 = vmatprep.mubr.msk.f32.mxu0 %vm309_vm5, %v892_v56  ;;  %2050 = vrcp.f32 %v1169_v58  ;;  %v1506_v56 = vld [vmem:[%s2421_s7 + $0x28] sm:$0xff]  ;;  %v1507_v58 = vld [vmem:[%s2421_s7 + $0x30] sm:$0xff] }
 0x8ee   :  { %1797 = vmatmul.mubr.msk.f32.vlgmr.msra.gmra.mrb[2].mxu0 %vm309_vm5, %v893_v41  ;;  %2052 = vrcp.f32 %v1172_v52  ;;  %v1504_v52 = vld [vmem:[%s2421_s7 + $0x18] sm:$0xff]  ;;  %v1933_v41 = vpack.c.bf16 %v1506_v56, %v1505_v54 }
 0x8ef   :  { %1800 = vmatpush3.msra.mxu0 %v217_v38  ;;  %v1503_v38 = vld [vmem:[%s2421_s7 + $0x10] sm:$0xff] }
 0x8f0   :  { %v2015_v59 = vpop.permute.xlu1 %2014  ;;  %v1929_v53 = vpack.c.bf16 %v1504_v52, %v1503_v38 }
 0x8f1   :  { %v2017_v60 = vunpack.i.h.bf16 %v2015_v59  ;;  %v2016_v61 = vunpack.i.l.bf16 %v2015_v59  ;;  %v1508_v59 = vld [vmem:[%s2421_s7 + $0x38] sm:$0xff] }
 0x8f3   :  { %v1913_v62 = vpack.c.bf16 %v2017_v60, %v2016_v61  ;;  %v1937_v60 = vpack.c.bf16 %v1508_v59, %v1507_v58  ;;  %v1509_v61 = vld [vmem:[%s2421_s7 + $0x40] sm:$0xff] }
 0x8f5   :  { %1914 = vmatprep.subr.bf16.mxu0 %v1913_v62 }
 0x8f7   :  { %v2051_v63 = vpop.eup %2050 }
 0x8f8   :  { %v2053_v4 = vpop.eup %2052  ;;  %v1175_v5 = vmul.f32 %v2051_v63, %v2045_v43 }
 0x8f9   :  { %v1176_v6 = vmul.f32 %v2053_v4, %v2043_v39  ;;  %v1655_v39 = vld [vmem:[%s2415_s1 + $0x4] ss:$0 sm:$0xff] }
 0x9c1   :  { %v1798_v2 = vpop.f32.mrb[2].mxu0 }
 0x9c2   :  { %v972_v3 = vpop.f32.mrb[3].mxu0 }
 0x9c3   :  { %1801 = vmatprep.mubr.msk.f32.mxu0 %vm225_vm1, %v972_v3  ;;  %v1512_v3 = vld [vmem:[%s2421_s7 + $0x58] sm:$0xff] }
 0x9c4   :  { %1802 = vmatmul.mubr.msk.f32.vlgmr.msra.gmra.mrb[0].mxu0 %vm225_vm1, %v1798_v2  ;;  %v1511_v2 = vld [vmem:[%s2421_s7 + $0x50] sm:$0xff] }
 0x9c5   :  { %1916 = vmatpush3.bf16.msra.mxu0 %v1913_v62  ;;  %1815 = vmatprep.mubr.msk.f32.mxu0 %vm309_vm5, %v1175_v5  ;;  %v1510_v62 = vld [vmem:[%s2421_s7 + $0x48] sm:$0xff]  ;;  %v1945_v4 = vpack.c.bf16 %v1512_v3, %v1511_v2  ;;  %v1513_v5 = vld [vmem:[%s2421_s7 + $0x60] sm:$0xff] }
 0x9c6   :  { %1818 = vmatprep.subr.mxu0 %v218_v40  ;;  %v1941_v63 = vpack.c.bf16 %v1510_v62, %v1509_v61 }
 0x9c8   :  { %1816 = vmatmul.mubr.msk.f32.vlgmr.msra.gmra.mrb[4].mxu0 %vm309_vm5, %v1176_v6 }
 0x9c9   :  { %1819 = vmatpush3.msra.mxu0 %v218_v40  ;;  %v1514_v40 = vld [vmem:[%s2421_s7 + $0x68] sm:$0xff] }
 0x9ca   :  { %1926 = vmatprep.subr.bf16.mxu0 %v1925_v51  ;;  %v1949_v6 = vpack.c.bf16 %v1514_v40, %v1513_v5 }
 0xa9b   :  { %v1817_v7 = vpop.f32.mrb[4].mxu0 }
 0xa9c   :  { %v1255_v8 = vpop.f32.mrb[5].mxu0 }
 0xa9d   :  { %1820 = vmatprep.mubr.msk.f32.mxu0 %vm225_vm1, %v1255_v8  ;;  %v1516_v8 = vld [vmem:[%s2421_s7 + $0x78] sm:$0xff] }
 0xa9e   :  { %1821 = vmatmul.mubr.msk.f32.vlgmr.msra.gmra.mrb[0].mxu0 %vm225_vm1, %v1817_v7  ;;  %v1515_v7 = vld [vmem:[%s2421_s7 + $0x70] sm:$0xff] }
 0xa9f   :  { %1928 = vmatpush3.bf16.msra.mxu0 %v1925_v51 }
 0xaa0   :  { %1930 = vmatprep.subr.bf16.mxu0 %v1929_v53 }
 0xaa3   :  { %1932 = vmatpush3.bf16.msra.mxu0 %v1929_v53 }
 0xaa4   :  { %1934 = vmatprep.subr.bf16.mxu0 %v1933_v41 }
 0xaa7   :  { %1936 = vmatpush3.bf16.msra.mxu0 %v1933_v41 }
 0xaa8   :  { %1938 = vmatprep.subr.bf16.mxu0 %v1937_v60 }
 0xaab   :  { %1940 = vmatpush3.bf16.msra.mxu0 %v1937_v60 }
 0xaac   :  { %1942 = vmatprep.subr.bf16.mxu0 %v1941_v63 }
 0xaaf   :  { %1944 = vmatpush3.bf16.msra.mxu0 %v1941_v63 }
 0xab0   :  { %1946 = vmatprep.subr.bf16.mxu0 %v1945_v4 }
 0xab3   :  { %1948 = vmatpush3.bf16.msra.mxu0 %v1945_v4 }
 0xab4   :  { %1950 = vmatprep.subr.bf16.mxu0 %v1949_v6 }
 0xab7   :  { %1952 = vmatpush3.bf16.msra.mxu0 %v1949_v6 }
 0xb71   :  { %v1822_v10 = vpop.f32.mrb[0].mxu0 }
 0xb72   :  { %v1352_v11 = vadd.f32 %v1822_v10, %v1653_v9  ;;  %v1336_v12 = vpop.f32.mrb[1].mxu0  ;;  %v1656_v10 = vld [vmem:[%s2420_s6] ss:$0 sm:$0xff] }
 0xb73   :  { %v1351_v45 = vadd.f32 %v1653_v9, %v1336_v12  ;;  %v1953_v9 = vpack.c.bf16 %v1516_v8, %v1515_v7 }
 0xb74   :  { %v2311_v13 = vadd.f32 %v1352_v11, %v2158_v1 }
 0xb75   :  { %v2314_v14 = vadd.f32 %v1351_v45, %v2153_v0  ;;  %1954 = vmatprep.subr.bf16.mxu0 %v1953_v9 }
 0xb76   :  { %v1358_v15 = vsel %vm83_vm0, %v2311_v13, 0.0  ;;  %1956 = vmatpush3.bf16.msra.mxu0 %v1953_v9 }
 0xb77   :  { %1359 = vadd.xlane.f32.xlu1 %v1358_v15  ;;  %v1355_v16 = vsel %vm83_vm0, %v2314_v14, 0.0 }
 0xb78   :  { %1356 = vadd.xlane.f32.xlu0 %v1355_v16 }
 0xc04   :  { %v1360_v17 = vpop.xlane.xlu1 %1359 }
 0xc05   :  { %v1362_v18 = vmul.f32 0.03125, %v1360_v17  ;;  %v1357_v19 = vpop.xlane.xlu0 %1356 }
 0xc06   :  { %v1361_v20 = vmul.f32 0.03125, %v1357_v19 }
 0xc07   :  { %v1364_v21 = vsub.f32 %v2311_v13, %v1362_v18 }
 0xc08   :  { %v1363_v1 = vsub.f32 %v2314_v14, %v1361_v20 }
 0xc09   :  { %v1366_v23 = vmul.f32 %v1364_v21, %v1364_v21 }
 0xc0a   :  { %v1365_v22 = vmul.f32 %v1363_v1, %v1363_v1 }
 0xc0b   :  { %v1370_v24 = vsel %vm83_vm0, %v1366_v23, 0.0 }
 0xc0c   :  { %v1367_v0 = vsel %vm83_vm0, %v1365_v22, 0.0 }
 0xc0d   :  { %1368 = vadd.xlane.f32.xlu0 %v1367_v0 }
 0xc11   :  { %1371 = vadd.xlane.f32.xlu0 %v1370_v24 }
 0xc9a   :  { %v1369_v31 = vpop.xlane.xlu0 %1368 }
 0xc9b   :  { %v1373_v32 = vmul.f32 0.03125, %v1369_v31 }
 0xc9d   :  { %v1375_v55 = vadd.f32 1e-05, %v1373_v32 }
 0xc9e   :  { %v1372_v33 = vpop.xlane.xlu0 %1371 }
 0xc9f   :  { %2054 = vrsqrt.f32 %v1375_v55  ;;  %v1374_v57 = vmul.f32 0.03125, %v1372_v33 }
 0xca1   :  { %v1376_v34 = vadd.f32 1e-05, %v1374_v57 }
 0xca3   :  { %2056 = vrsqrt.f32 %v1376_v34 }
 0xca9   :  { %v2055_v35 = vpop.eup %2054 }
 0xcaa   :  { %v1379_v37 = vmul.f32 %v2055_v35, %v1363_v1 }
 0xcac   :  { %v1385_v42 = vmul.f32 %v1654_v36, %v1379_v37 }
 0xcad   :  { %v2057_v43 = vpop.eup %2056 }
 0xcae   :  { %v1380_v44 = vmul.f32 %v2057_v43, %v1364_v21  ;;  %v1391_v46 = vadd.f32 %v1655_v39, %v1385_v42 }
 0xcb0   :  { %v1386_v47 = vmul.f32 %v1654_v36, %v1380_v44  ;;  %1831 = vmatprep.mubr.msk.f32.mxu1 %vm83_vm0, %v1391_v46 }
 0xcb2   :  { %v1392_v48 = vadd.f32 %v1655_v39, %v1386_v47 }
 0xcb4   :  { %1832 = vmatmul.mubr.msk.f32.vlgmr.msra.gmra.mrb[14].mxu1 %vm83_vm0, %v1392_v48 }
 0xd87   :  { %v1833_v11 = vpop.f32.mrb[14].mxu1 }
 0xd88   :  { %v1482_v12 = vadd.f32 %v1833_v11, %v1656_v10  ;;  %v1476_v45 = vpop.f32.mrb[15].mxu1 }
 0xd89   :  { %v1477_v15 = vadd.f32 %v1656_v10, %v1476_v45 }
 0xd8a   :  { %v1660_v16 = vmul.f32 -1.702, %v1482_v12 }
 0xd8b   :  { %v1659_v17 = vmul.f32 -1.702, %v1477_v15 }
 0xd8c   :  { %v1491_v18 = vmul.f32 1.442695, %v1660_v16 }
 0xd8d   :  { %v1489_v19 = vmul.f32 1.442695, %v1659_v17 }
 0xd8e   :  { %2058 = vpow2.f32 %v1491_v18 }
 0xd8f   :  { %2060 = vpow2.f32 %v1489_v19 }
 0xd98   :  { %v2059_v20 = vpop.eup %2058 }
 0xd99   :  { %v2061_v21 = vpop.eup %2060  ;;  %v1494_v1 = vadd.f32 1.0, %v2059_v20 }
 0xd9a   :  { %v1493_v22 = vadd.f32 1.0, %v2061_v21 }
 0xd9b   :  { %2062 = vrcp.f32 %v1494_v1 }
 0xd9c   :  { %2064 = vrcp.f32 %v1493_v22 }
 0xda5   :  { %v2063_v0 = vpop.eup %2062 }
 0xda6   :  { %v2065_v23 = vpop.eup %2064  ;;  %v1500_v25 = vmul.f32 %v2063_v0, %v1482_v12 }
 0xda7   :  { %v1499_v24 = vmul.f32 %v2065_v23, %v1477_v15 }
 0xda9   :  { %1866 = vmatprep.mubr.f32.mxu0 %v1499_v24 }
 0xdaa   :  { %1867 = vmatmul.mubr.f32.vlgmr.msra.gmra.mrb[6].mxu0 %v1500_v25 }
 0xe7d   :  { %v1868_v27 = vpop.f32.mrb[6].mxu0 }
 0xe7e   :  { %v1593_v28 = vadd.f32 %v1868_v27, %v1661_v26  ;;  %v1587_v29 = vpop.f32.mrb[7].mxu0 }
 0xe7f   :  { %v1588_v30 = vadd.f32 %v1661_v26, %v1587_v29 }
 0xe80   :  { %v1597_v31 = vadd.f32 %v1593_v28, %v2311_v13 }
 0xe81   :  { %v1596_v32 = vadd.f32 %v1588_v30, %v2314_v14 }
 0xe82   :  { %1599 = vst.msk [vmem:[#allocation2 + $0x8] sm:$0xff] %vm83_vm0, %v1597_v31 }
 0xe83   :  { %1598 = vst.msk [vmem:[#allocation2] sm:$0xff] %vm83_vm0, %v1596_v32 }
 0xe84   :  { %2077 = shalt.err (!%p2074_p4)
}
 0xe85   :  { %s2078_s14 = scalar_lea.hbm %s2422_s8, 256 }
 0xe86   :  { %p2079_p5 = scmp.ne.s32.totalorder %s2422_s8, %s2078_s14  ;;  %p2082_p6 = scmp.lt.u32.totalorder %s2078_s14, %s2422_s8 }
 0xe88   :  { %p2084_p7 = pnand %p2082_p6, %p2079_p5 }
 0xe8a   :  { %2087 = shalt.err (!%p2084_p7)
}
 0xe8b   :  { %s2103_s2 = smov 128   ;;  %s2104_s18 = smov 8  }
 0xe8c   :  { %1611 = dma.vmem_to_hbm [thread:$0]  %s1606_s11, 256, %s2422_s8, [#allocation3], %s2103_s2, %s2103_s2, %s2104_s18  }
 0xe8d   :  { %2088 = dma.done.wait [#allocation3], 256  }
 0xe8e   :  { %2089 = vsyncadd [#allocation3], 4294967040 }
 0xe8f   :  { %1615 = vsyncpa [#allocation3], 1 }

</bundles_post_ra>
